<compile_context>
chip_gen: v5e
topology: v5e:2x2
jax: 0.10.0
libtpu: 0.0.40
codegen_flags: <defaults>
</compile_context>

<pallas_src>
import jax
import jax.numpy as jnp
from jax.experimental import pallas as pl
from jax.experimental.pallas import tpu as pltpu

NUM_CLASSES = 10
LANE = 128


def _round_up(n, m):
    return ((n + m - 1) // m) * m


def mlp_logsoftmax_kernel(x_ref, w0_ref, b0_ref, w1_ref, b1_ref,
                          w2_ref, b2_ref, o_ref):
    # x tile arrives f32 straight from HBM; cast to bf16 for the MXU here.
    x = x_ref[...].astype(jnp.bfloat16)                              # (TB, D)

    # fc0 + ReLU  (f32 accumulation, bf16 activations)
    h0 = jnp.dot(x, w0_ref[...], preferred_element_type=jnp.float32)
    h0 = jnp.maximum(h0 + b0_ref[...], 0.0).astype(jnp.bfloat16)     # (TB, 128)

    # fc1 + ReLU
    h1 = jnp.dot(h0, w1_ref[...], preferred_element_type=jnp.float32)
    h1 = jnp.maximum(h1 + b1_ref[...], 0.0).astype(jnp.bfloat16)     # (TB, 128)

    # fc2 (logits).  Padded class columns get -1e30 via the baked-in bias
    # (w2's padded columns are zero), so no explicit mask is needed.
    logits = jnp.dot(h1, w2_ref[...], preferred_element_type=jnp.float32)
    logits = logits + b2_ref[...]                                    # (TB, 128)

    # Numerically stable log_softmax over dim=1 (f32 VPU/EUP math).
    m = jnp.max(logits, axis=1, keepdims=True)
    shifted = logits - m
    lse = jnp.log(jnp.sum(jnp.exp(shifted), axis=1, keepdims=True))
    o_ref[...] = (shifted - lse).astype(o_ref.dtype)


def init_params(key, image_size):
    """Deterministic init; logical shapes match nn.Linear(image_size,100)/(100,50)/(50,10)."""
    ks = jax.random.split(key, 6)

    def linear(kw, kb, fan_in, fan_out):
        bound = 1.0 / jnp.sqrt(fan_in)
        w = jax.random.uniform(kw, (fan_in, fan_out), jnp.float32, -bound, bound)
        b = jax.random.uniform(kb, (1, fan_out), jnp.float32, -bound, bound)
        return w, b

    w0, b0 = linear(ks[0], ks[1], image_size, 100)
    w1, b1 = linear(ks[2], ks[3], 100, 50)
    w2, b2 = linear(ks[4], ks[5], 50, 10)
    return (w0, b0, w1, b1, w2, b2)


def pad_params(params, image_size, num_classes=NUM_CLASSES):
    """One-time: pad hidden/output dims to 128 lanes, cast weights to bf16.

    w0 keeps its logical fan_in rows (the x BlockSpec uses the full image_size
    as its last dim).  b2's padded columns carry -1e30 so padded logits can
    never affect the log_softmax.
    """
    w0, b0, w1, b1, w2, b2 = params
    H0p = _round_up(w0.shape[1], LANE)   # 100 -> 128
    H1p = _round_up(w1.shape[1], LANE)   # 50  -> 128
    Cp = _round_up(w2.shape[1], LANE)    # 10  -> 128

    def pad2(a, r, c):
        return jnp.pad(a, ((0, r - a.shape[0]), (0, c - a.shape[1])))

    w0p = pad2(w0, image_size, H0p).astype(jnp.bfloat16)   # rows = logical fan_in
    w1p = pad2(w1, H0p, H1p).astype(jnp.bfloat16)
    w2p = pad2(w2, H1p, Cp).astype(jnp.bfloat16)
    b0p = pad2(b0, 1, H0p).astype(jnp.float32)
    b1p = pad2(b1, 1, H1p).astype(jnp.float32)
    # Bake the class mask into the bias: padded columns -> -1e30.
    b2p = jnp.full((1, Cp), -1e30, jnp.float32).at[:, :num_classes].set(b2[0])
    return (w0p, b0p, w1p, b1p, w2p, b2p)


def model_ab_forward(x, padded_params, image_size, *,
                     num_classes=NUM_CLASSES, tile_b=2048):
    """x: any shape flattenable to (-1, image_size). Returns (B, 10) f32 log-probs."""
    w0, b0, w1, b1, w2, b2 = padded_params
    Cp = w2.shape[1]

    x2 = x.reshape(-1, image_size)        # mirrors x.view(-1, image_size); no pad/cast copy
    B = x2.shape[0]
    if B == 0:
        return jnp.zeros((0, num_classes), jnp.float32)

    # --- batch-tile selection -------------------------------------------------
    # Per-step VMEM: 2 double-buffered f32 x tiles + 2 bf16 out tiles (+ ~0.5 MB
    # resident weights).  Keep it under ~12 MiB so it fits v5e's 16 MiB scoped
    # VMEM default and leaves ample headroom on v6e (32/128 MiB) and v7x (32/64).
    per_row = 2 * image_size * 4 + 2 * LANE * 2
    tb_cap = max(8, ((11 * 1024 * 1024) // per_row) // 8 * 8)
    tb = min(tile_b, tb_cap, _round_up(B, 8))
    # Keep >= 2 grid steps for large batches so both v7x TensorCores get work.
    if B >= 2 * LANE:
        tb = min(tb, _round_up(pl.cdiv(B, 2), 8))
    tb = max(8, (tb // 8) * 8)

    grid = (pl.cdiv(B, tb),)              # partial last block handled by Pallas
    rep = lambda shape: pl.BlockSpec(shape, lambda i: (0, 0))  # resident weights

    out_p = pl.pallas_call(
        mlp_logsoftmax_kernel,
        out_shape=jax.ShapeDtypeStruct((B, Cp), jnp.bfloat16),   # lane-dense bf16 slab
        grid_spec=pltpu.PrefetchScalarGridSpec(
            num_scalar_prefetch=0,
            grid=grid,
            in_specs=[
                # x: f32 straight from HBM; last dim = full image_size is legal
                # even when image_size % 128 != 0 ("equal full dim" rule).
                pl.BlockSpec((tb, image_size), lambda i: (i, 0)),
                rep(w0.shape), rep(b0.shape),                    # fc0
                rep(w1.shape), rep(b1.shape),                    # fc1
                rep(w2.shape), rep(b2.shape),                    # fc2
            ],
            out_specs=pl.BlockSpec((tb, Cp), lambda i: (i, 0)),
        ),
        compiler_params=pltpu.CompilerParams(
            dimension_semantics=("parallel",)),                  # batch axis -> megacore
    )(x2, w0, b0, w1, b1, w2, b2)

    return out_p[:, :num_classes].astype(jnp.float32)


if __name__ == "__main__":
    key = jax.random.PRNGKey(0)
    k_x, k_p = jax.random.split(key)

    # Small shapes consistent with the module: x.view(-1, image_size)
    image_size = 256
    batch = 16
    x_img = jax.random.normal(k_x, (batch, 1, 16, 16), jnp.float32)  # NCHW-style

    params = init_params(k_p, image_size)
    padded_params = pad_params(params, image_size)

    out = model_ab_forward(x_img, padded_params, image_size)
    out = jax.block_until_ready(out)

    # Sanity check against pure-JAX f32 reference.
    # bf16 matmuls + bf16 output store -> loose tolerance (documented tradeoff).
    w0, b0, w1, b1, w2, b2 = params
    x = x_img.reshape(-1, image_size)
    h0 = jnp.maximum(x @ w0 + b0, 0.0)
    h1 = jnp.maximum(h0 @ w1 + b1, 0.0)
    logits = h1 @ w2 + b2
    ref = jax.nn.log_softmax(logits, axis=1)

    assert out.shape == (batch, NUM_CLASSES)
    assert bool(jnp.all(jnp.isfinite(out)))
    assert float(jnp.max(jnp.abs(out - ref))) < 5e-2

    print("KERNEL_OK")
</pallas_src>

<mosaic_0001>
module attributes {stable_mosaic.version = 11 : i64} {
  func.func @mlp_logsoftmax_kernel(%arg0: i32, %arg1: memref<16x256xf32, #tpu.memory_space<vmem>>, %arg2: memref<256x128xbf16, #tpu.memory_space<vmem>>, %arg3: memref<1x128xf32, #tpu.memory_space<vmem>>, %arg4: memref<128x128xbf16, #tpu.memory_space<vmem>>, %arg5: memref<1x128xf32, #tpu.memory_space<vmem>>, %arg6: memref<128x128xbf16, #tpu.memory_space<vmem>>, %arg7: memref<1x128xf32, #tpu.memory_space<vmem>>, %arg8: memref<16x128xbf16, #tpu.memory_space<vmem>>) attributes {dimension_semantics = [#tpu.dimension_semantics<parallel>], iteration_bounds = array<i64: 1>, scalar_prefetch = 0 : i64, scratch_operands = 0 : i64, tpu.core_type = #tpu.core_type<tc>, window_params = [{transform_indices = @transform_0, window_bounds = array<i64: 16, 256>}, {pipeline_mode = #tpu.pipeline_mode<synchronous>, transform_indices = @transform_1, window_bounds = array<i64: 256, 128>}, {pipeline_mode = #tpu.pipeline_mode<synchronous>, transform_indices = @transform_2, window_bounds = array<i64: 1, 128>}, {pipeline_mode = #tpu.pipeline_mode<synchronous>, transform_indices = @transform_3, window_bounds = array<i64: 128, 128>}, {pipeline_mode = #tpu.pipeline_mode<synchronous>, transform_indices = @transform_4, window_bounds = array<i64: 1, 128>}, {pipeline_mode = #tpu.pipeline_mode<synchronous>, transform_indices = @transform_5, window_bounds = array<i64: 128, 128>}, {pipeline_mode = #tpu.pipeline_mode<synchronous>, transform_indices = @transform_6, window_bounds = array<i64: 1, 128>}, {transform_indices = @transform_7, window_bounds = array<i64: 16, 128>}]} {
    %c0 = arith.constant 0 : index
    %c0_0 = arith.constant 0 : index
    %0 = vector.load %arg1[%c0, %c0_0] : memref<16x256xf32, #tpu.memory_space<vmem>>, vector<16x256xf32>
    %1 = arith.truncf %0 : vector<16x256xf32> to vector<16x256xbf16>
    %c0_1 = arith.constant 0 : index
    %c0_2 = arith.constant 0 : index
    %2 = vector.load %arg2[%c0_1, %c0_2] : memref<256x128xbf16, #tpu.memory_space<vmem>>, vector<256x128xbf16>
    %cst = arith.constant dense<0.000000e+00> : vector<16x128xf32>
    %3 = tpu.matmul %1, %2, %cst {dimension_numbers = #tpu.dot_dimension_numbers<[1], [0], [0], [1], [0, 0, 1, 1], [], []>} : vector<16x256xbf16>, vector<256x128xbf16>, vector<16x128xf32> -> vector<16x128xf32>
    %c0_3 = arith.constant 0 : index
    %c0_4 = arith.constant 0 : index
    %4 = vector.load %arg3[%c0_3, %c0_4] : memref<1x128xf32, #tpu.memory_space<vmem>>, vector<1x128xf32>
    %5 = vector.broadcast %4 : vector<1x128xf32> to vector<16x128xf32>
    %6 = arith.addf %3, %5 : vector<16x128xf32>
    %cst_5 = arith.constant 0.000000e+00 : f32
    %7 = vector.broadcast %cst_5 : f32 to vector<16x128xf32>
    %8 = arith.maximumf %6, %7 : vector<16x128xf32>
    %9 = arith.truncf %8 : vector<16x128xf32> to vector<16x128xbf16>
    %c0_6 = arith.constant 0 : index
    %c0_7 = arith.constant 0 : index
    %10 = vector.load %arg4[%c0_6, %c0_7] : memref<128x128xbf16, #tpu.memory_space<vmem>>, vector<128x128xbf16>
    %cst_8 = arith.constant dense<0.000000e+00> : vector<16x128xf32>
    %11 = tpu.matmul %9, %10, %cst_8 {dimension_numbers = #tpu.dot_dimension_numbers<[1], [0], [0], [1], [0, 0, 1, 1], [], []>} : vector<16x128xbf16>, vector<128x128xbf16>, vector<16x128xf32> -> vector<16x128xf32>
    %c0_9 = arith.constant 0 : index
    %c0_10 = arith.constant 0 : index
    %12 = vector.load %arg5[%c0_9, %c0_10] : memref<1x128xf32, #tpu.memory_space<vmem>>, vector<1x128xf32>
    %13 = vector.broadcast %12 : vector<1x128xf32> to vector<16x128xf32>
    %14 = arith.addf %11, %13 : vector<16x128xf32>
    %cst_11 = arith.constant 0.000000e+00 : f32
    %15 = vector.broadcast %cst_11 : f32 to vector<16x128xf32>
    %16 = arith.maximumf %14, %15 : vector<16x128xf32>
    %17 = arith.truncf %16 : vector<16x128xf32> to vector<16x128xbf16>
    %c0_12 = arith.constant 0 : index
    %c0_13 = arith.constant 0 : index
    %18 = vector.load %arg6[%c0_12, %c0_13] : memref<128x128xbf16, #tpu.memory_space<vmem>>, vector<128x128xbf16>
    %cst_14 = arith.constant dense<0.000000e+00> : vector<16x128xf32>
    %19 = tpu.matmul %17, %18, %cst_14 {dimension_numbers = #tpu.dot_dimension_numbers<[1], [0], [0], [1], [0, 0, 1, 1], [], []>} : vector<16x128xbf16>, vector<128x128xbf16>, vector<16x128xf32> -> vector<16x128xf32>
    %c0_15 = arith.constant 0 : index
    %c0_16 = arith.constant 0 : index
    %20 = vector.load %arg7[%c0_15, %c0_16] : memref<1x128xf32, #tpu.memory_space<vmem>>, vector<1x128xf32>
    %21 = vector.broadcast %20 : vector<1x128xf32> to vector<16x128xf32>
    %22 = arith.addf %19, %21 : vector<16x128xf32>
    %cst_17 = arith.constant dense<0xFF800000> : vector<16xf32>
    %23 = vector.multi_reduction <maximumf>, %22, %cst_17 [1] : vector<16x128xf32> to vector<16xf32>
    %24 = vector.shape_cast %23 : vector<16xf32> to vector<16x1xf32>
    %25 = vector.broadcast %24 : vector<16x1xf32> to vector<16x128xf32>
    %26 = arith.subf %22, %25 : vector<16x128xf32>
    %27 = math.exp %26 : vector<16x128xf32>
    %cst_18 = arith.constant dense<0.000000e+00> : vector<16xf32>
    %28 = vector.multi_reduction <add>, %27, %cst_18 [1] : vector<16x128xf32> to vector<16xf32>
    %29 = vector.shape_cast %28 : vector<16xf32> to vector<16x1xf32>
    %30 = math.log %29 : vector<16x1xf32>
    %31 = vector.broadcast %30 : vector<16x1xf32> to vector<16x128xf32>
    %32 = arith.subf %26, %31 : vector<16x128xf32>
    %33 = arith.truncf %32 : vector<16x128xf32> to vector<16x128xbf16>
    %c0_19 = arith.constant 0 : index
    %c0_20 = arith.constant 0 : index
    %34 = vector.load %arg8[%c0_19, %c0_20] : memref<16x128xbf16, #tpu.memory_space<vmem>>, vector<16x128xbf16>
    tpu.vector_store %arg8[%c0_19, %c0_20], %33 {strides = array<i32>} : memref<16x128xbf16, #tpu.memory_space<vmem>>, vector<16x128xbf16>,
    return
  }
  func.func @transform_0(%arg0: i32) -> (i32, i32) {
    %c0_i32 = arith.constant 0 : i32
    %c0_i32_0 = arith.constant 0 : i32
    return %arg0, %c0_i32 : i32, i32
  }
  func.func @transform_1(%arg0: i32) -> (i32, i32) {
    %c0_i32 = arith.constant 0 : i32
    %c0_i32_0 = arith.constant 0 : i32
    %c0_i32_1 = arith.constant 0 : i32
    return %c0_i32, %c0_i32_0 : i32, i32
  }
  func.func @transform_2(%arg0: i32) -> (i32, i32) {
    %c0_i32 = arith.constant 0 : i32
    %c0_i32_0 = arith.constant 0 : i32
    %c0_i32_1 = arith.constant 0 : i32
    return %c0_i32, %c0_i32_0 : i32, i32
  }
  func.func @transform_3(%arg0: i32) -> (i32, i32) {
    %c0_i32 = arith.constant 0 : i32
    %c0_i32_0 = arith.constant 0 : i32
    %c0_i32_1 = arith.constant 0 : i32
    return %c0_i32, %c0_i32_0 : i32, i32
  }
  func.func @transform_4(%arg0: i32) -> (i32, i32) {
    %c0_i32 = arith.constant 0 : i32
    %c0_i32_0 = arith.constant 0 : i32
    %c0_i32_1 = arith.constant 0 : i32
    return %c0_i32, %c0_i32_0 : i32, i32
  }
  func.func @transform_5(%arg0: i32) -> (i32, i32) {
    %c0_i32 = arith.constant 0 : i32
    %c0_i32_0 = arith.constant 0 : i32
    %c0_i32_1 = arith.constant 0 : i32
    return %c0_i32, %c0_i32_0 : i32, i32
  }
  func.func @transform_6(%arg0: i32) -> (i32, i32) {
    %c0_i32 = arith.constant 0 : i32
    %c0_i32_0 = arith.constant 0 : i32
    %c0_i32_1 = arith.constant 0 : i32
    return %c0_i32, %c0_i32_0 : i32, i32
  }
  func.func @transform_7(%arg0: i32) -> (i32, i32) {
    %c0_i32 = arith.constant 0 : i32
    %c0_i32_0 = arith.constant 0 : i32
    return %arg0, %c0_i32 : i32, i32
  }
}

</mosaic_0001>

<bundles_post_ra>
// kernel: tpu_custom_call.1
= control target key start
LH: loop header
LB: loop body
LE: loop exit
PB: predicated region body
PF: predicated region fallthrough
CT: control target
= control target key end

     0   :  { %12 = vsyncpa [#allocation3], 0  ;;  %s869_s0 = inlined_call_operand.hbm [shape: f32[16,256], index: 0, kind: input, shape index: {}]   ;;  %s870_s1 = inlined_call_operand.hbm [shape: bf16[256,128], index: 1, kind: input, shape index: {}]   ;;  %s871_s2 = inlined_call_operand.vmem [shape: f32[1,128], index: 2, kind: input, shape index: {}]   ;;  %s872_s3 = inlined_call_operand.hbm [shape: bf16[128,128], index: 3, kind: input, shape index: {}]   ;;  %s873_s4 = inlined_call_operand.vmem [shape: f32[1,128], index: 4, kind: input, shape index: {}]   ;;  %s874_s5 = inlined_call_operand.hbm [shape: bf16[128,128], index: 5, kind: input, shape index: {}]   ;;  %s875_s6 = inlined_call_operand.vmem [shape: f32[1,128], index: 6, kind: input, shape index: {}]   ;;  %s876_s7 = inlined_call_operand.hbm [shape: bf16[16,128], index: 7, kind: output, shape index: {}]  }
   0x1   :  { %13 = vsyncpa [#allocation6], 0 }
   0x2   :  { %14 = vsyncpa [#allocation9], 0  ;;  %s33_s26 = sshll.u32 %s870_s1, 4  ;;  %s34_s26 = int_to_ptr.hbm [resolvable:$true] %s33_s26 }
   0x3   :  { %15 = vsyncpa [#allocation4], 0  ;;  %s784_s27 = smov [#allocation5]   ;;  %s20_s8 = sshll.u32 %s869_s0, 4  ;;  %s21_s8 = int_to_ptr.hbm [resolvable:$true] %s20_s8 }
   0x4   :  { %s35_s28 = sshll.u32 %s784_s27, 4  ;;  %s785_s9 = smov 64   ;;  %s36_s28 = int_to_ptr.vmem [resolvable:$true] %s35_s28 }
   0x5   :  { %s786_s10 = smov 4   ;;  %s787_s11 = smov [#allocation2]  }
   0x6   :  { %41 = dma.hbm_to_vmem [thread:$0]  %s34_s26, 2048, %s36_s28, [#allocation6], %s785_s9, %s785_s9, %s786_s10  }
   0x7   :  { %s22_s12 = sshll.u32 %s787_s11, 4  ;;  %s788_s1 = smov 256   ;;  %s23_s12 = int_to_ptr.vmem [resolvable:$true] %s22_s12 }
   0x8   :  { %s789_s13 = smov 16   ;;  %s48_s16 = sshll.u32 %s872_s3, 4  ;;  %s49_s16 = int_to_ptr.hbm [resolvable:$true] %s48_s16 }
   0x9   :  { %28 = dma.hbm_to_vmem [thread:$0]  %s21_s8, 512, %s23_s12, [#allocation3], %s788_s1, %s788_s1, %s789_s13  }
   0xa   :  { %s790_s17 = smov [#allocation7]   ;;  %s63_s20 = sshll.u32 %s874_s5, 4  ;;  %s64_s20 = int_to_ptr.hbm [resolvable:$true] %s63_s20 }
   0xb   :  { %s50_s0 = sshll.u32 %s790_s17, 4  ;;  %s791_s21 = smov [#allocation8]   ;;  %s51_s0 = int_to_ptr.vmem [resolvable:$true] %s50_s0 }
   0xc   :  { %56 = dma.hbm_to_vmem [thread:$0]  %s49_s16, 1024, %s51_s0, [#allocation6], %s785_s9, %s785_s9, %s786_s10  }
   0xd   :  { %s65_s22 = sshll.u32 %s791_s21, 4  ;;  %s66_s22 = int_to_ptr.vmem [resolvable:$true] %s65_s22 }
   0xe   :  { %71 = dma.hbm_to_vmem [thread:$0]  %s64_s20, 1024, %s66_s22, [#allocation9], %s785_s9, %s785_s9, %s786_s10  }
   0xf   :  { %776 = dma.done.wait [#allocation3], 512  }
  0x10   :  { %777 = vsyncadd [#allocation3], 4294966784 }
  0x11   :  { %778 = dma.done.wait [#allocation6], 3072  }
  0x12   :  { %779 = vsyncadd [#allocation6], 4294964224 }
  0x13   :  { %780 = dma.done.wait [#allocation9], 1024  }
  0x14   :  { %781 = vsyncadd [#allocation9], 4294966272  ;;  %v606_v0 = vld [vmem:[#allocation5 + $0x38] sm:$0xff]  ;;  %v605_v2 = vld [vmem:[#allocation5 + $0x30] sm:$0xff]  ;;  %s456_s28 = sshll.u32 %s876_s7, 4  ;;  %s457_s28 = int_to_ptr.hbm [resolvable:$true] %s456_s28 }
  0x15   :  { %v614_v1 = vld [vmem:[#allocation5 + $0x78] sm:$0xff]  ;;  %228 = vmatpush.bf16.msra.mxu0 %v606_v0  ;;  %v613_v3 = vld [vmem:[#allocation5 + $0x70] sm:$0xff]  ;;  %v604_v4 = vld [vmem:[#allocation5 + $0x28] sm:$0xff] }
  0x16   :  { %242 = vmatpush.bf16.msra.mxu1 %v614_v1  ;;  %v612_v5 = vld [vmem:[#allocation5 + $0x68] sm:$0xff]  ;;  %v622_v6 = vld [vmem:[#allocation7 + $0x38] sm:$0xff]  ;;  %v621_v7 = vld [vmem:[#allocation7 + $0x30] sm:$0xff] }
  0x17   :  { %327 = vmatpush.bf16.msra.mxu2 %v622_v6  ;;  %v603_v8 = vld [vmem:[#allocation5 + $0x20] sm:$0xff]  ;;  %v620_v10 = vld [vmem:[#allocation7 + $0x28] sm:$0xff]  ;;  %v602_v11 = vld [vmem:[#allocation5 + $0x18] sm:$0xff] }
  0x18   :  { %v611_v9 = vld [vmem:[#allocation5 + $0x60] sm:$0xff]  ;;  %v610_v12 = vld [vmem:[#allocation5 + $0x58] sm:$0xff]  ;;  %v601_v14 = vld [vmem:[#allocation5 + $0x10] sm:$0xff] }
  0x19   :  { %229 = vmatpush.bf16.msra.mxu0 %v605_v2  ;;  %v619_v13 = vld [vmem:[#allocation7 + $0x20] sm:$0xff]  ;;  %v609_v15 = vld [vmem:[#allocation5 + $0x50] sm:$0xff]  ;;  %v600_v16 = vld [vmem:[#allocation5 + $0x8] sm:$0xff] }
  0x1a   :  { %243 = vmatpush.bf16.msra.mxu1 %v613_v3  ;;  %v608_v17 = vld [vmem:[#allocation5 + $0x48] sm:$0xff]  ;;  %v599_v18 = vld [vmem:[#allocation5] sm:$0xff]  ;;  %v92_v21 = vld [vmem:[#allocation2 + $0x10] sm:$0xff] }
  0x1b   :  { %328 = vmatpush.bf16.msra.mxu2 %v621_v7  ;;  %v607_v19 = vld [vmem:[#allocation5 + $0x40] sm:$0xff]  ;;  %v91_v22 = vld [vmem:[#allocation2 + $0x8] sm:$0xff]  ;;  %v93_v23 = vld [vmem:[#allocation2 + $0x18] sm:$0xff] }
  0x1c   :  { %v90_v20 = vld [vmem:[#allocation2] sm:$0xff]  ;;  %v95_v25 = vpack.c.bf16 %v93_v23, %v91_v22  ;;  %v618_v26 = vld [vmem:[#allocation7 + $0x18] sm:$0xff]  ;;  %v617_v27 = vld [vmem:[#allocation7 + $0x10] sm:$0xff] }
  0x1d   :  { %230 = vmatpush.bf16.msra.mxu0 %v604_v4  ;;  %v94_v24 = vpack.c.bf16 %v92_v21, %v90_v20  ;;  %v616_v28 = vld [vmem:[#allocation7 + $0x8] sm:$0xff]  ;;  %v615_v29 = vld [vmem:[#allocation7] sm:$0xff]  ;;  %v630_v30 = vld [vmem:[#allocation8 + $0x38] sm:$0xff] }
  0x1e   :  { %244 = vmatpush.bf16.msra.mxu1 %v612_v5  ;;  %412 = vmatpush.bf16.msra.mxu3 %v630_v30  ;;  %v629_v31 = vld [vmem:[#allocation8 + $0x30] sm:$0xff]  ;;  %v628_v32 = vld [vmem:[#allocation8 + $0x28] sm:$0xff]  ;;  %v627_v33 = vld [vmem:[#allocation8 + $0x20] sm:$0xff] }
  0x1f   :  { %329 = vmatpush.bf16.msra.mxu2 %v620_v10  ;;  %v645_v36 = vld [vmem:[%s871_s2] ss:$0 sm:$0xff]  ;;  %v626_v46 = vld [vmem:[#allocation8 + $0x18] sm:$0xff]  ;;  %v625_v47 = vld [vmem:[#allocation8 + $0x10] sm:$0xff] }
  0x20   :  { %v624_v48 = vld [vmem:[#allocation8 + $0x8] sm:$0xff]  ;;  %v623_v49 = vld [vmem:[#allocation8] sm:$0xff] }
  0x21   :  { %231 = vmatpush.bf16.msra.mxu0 %v603_v8  ;;  %v646_v51 = vld [vmem:[%s873_s4] ss:$0 sm:$0xff]  ;;  %s792_s4 = smov [#allocation10]  }
  0x22   :  { %245 = vmatpush.bf16.msra.mxu1 %v611_v9  ;;  %413 = vmatpush.bf16.msra.mxu3 %v629_v31  ;;  %v647_v58 = vld [vmem:[%s875_s6] ss:$0 sm:$0xff]  ;;  %s454_s6 = sshll.u32 %s792_s4, 4  ;;  %s455_s6 = int_to_ptr.vmem [resolvable:$true] %s454_s6 }
  0x23   :  { %330 = vmatpush.bf16.msra.mxu2 %v619_v13 }
  0x25   :  { %232 = vmatpush.bf16.msra.mxu0 %v602_v11 }
  0x26   :  { %246 = vmatpush.bf16.msra.mxu1 %v610_v12  ;;  %414 = vmatpush.bf16.msra.mxu3 %v628_v32 }
  0x27   :  { %331 = vmatpush.bf16.msra.mxu2 %v618_v26 }
  0x29   :  { %233 = vmatpush.bf16.msra.mxu0 %v601_v14 }
  0x2a   :  { %247 = vmatpush.bf16.msra.mxu1 %v609_v15  ;;  %415 = vmatpush.bf16.msra.mxu3 %v627_v33 }
  0x2b   :  { %332 = vmatpush.bf16.msra.mxu2 %v617_v27 }
  0x2d   :  { %234 = vmatpush.bf16.msra.mxu0 %v600_v16 }
  0x2e   :  { %248 = vmatpush.bf16.msra.mxu1 %v608_v17  ;;  %416 = vmatpush.bf16.msra.mxu3 %v626_v46 }
  0x2f   :  { %333 = vmatpush.bf16.msra.mxu2 %v616_v28 }
  0x31   :  { %235 = vmatpush.bf16.msra.mxu0 %v599_v18 }
  0x32   :  { %249 = vmatpush.bf16.msra.mxu1 %v607_v19  ;;  %417 = vmatpush.bf16.msra.mxu3 %v625_v47 }
  0x33   :  { %334 = vmatpush.bf16.msra.mxu2 %v615_v29 }
  0x34   :  { %236 = vmatmul.bf16.vlgmr.msra.gmra.mxu0 %v94_v24 }
  0x35   :  { %250 = vmatmul.bf16.vlgmr.msra.gmra.mxu1 %v95_v25 }
  0x36   :  { %418 = vmatpush.bf16.msra.mxu3 %v624_v48 }
  0x3a   :  { %419 = vmatpush.bf16.msra.mxu3 %v623_v49 }
  0xb1   :  { %v237_v34 = vpop.f32.mrf.mxu0 }
  0xb2   :  { %v251_v35 = vpop.f32.mrf.mxu1  ;;  %v238_v37 = vadd.f32 %v645_v36, %v237_v34 }
  0xb4   :  { %v252_v39 = vadd.f32 %v251_v35, %v238_v37 }
  0xb6   :  { %v256_v43 = vmax.f32 %v252_v39, 0.0 }
  0xb9   :  { %v239_v38 = vpop.f32.mrf.mxu0 }
  0xba   :  { %v240_v40 = vadd.f32 %v645_v36, %v239_v38  ;;  %v253_v41 = vpop.f32.mrf.mxu1 }
  0xbc   :  { %v254_v42 = vadd.f32 %v253_v41, %v240_v40 }
  0xbe   :  { %v257_v44 = vmax.f32 %v254_v42, 0.0 }
  0xc0   :  { %v258_v45 = vpack.c.bf16 %v257_v44, %v256_v43 }
  0xc2   :  { %335 = vmatmul.bf16.vlgmr.msra.gmra.mxu2 %v258_v45 }
 0x145   :  { %v336_v50 = vpop.f32.mrf.mxu2 }
 0x146   :  { %v337_v52 = vadd.f32 %v646_v51, %v336_v50 }
 0x148   :  { %v341_v55 = vmax.f32 %v337_v52, 0.0 }
 0x14d   :  { %v338_v53 = vpop.f32.mrf.mxu2 }
 0x14e   :  { %v339_v54 = vadd.f32 %v646_v51, %v338_v53 }
 0x150   :  { %v342_v56 = vmax.f32 %v339_v54, 0.0 }
 0x152   :  { %v343_v57 = vpack.c.bf16 %v342_v56, %v341_v55 }
 0x154   :  { %420 = vmatmul.bf16.vlgmr.msra.gmra.mxu3 %v343_v57 }
 0x1d7   :  { %v421_v59 = vpop.f32.mrf.mxu3 }
 0x1d8   :  { %v422_v60 = vadd.f32 %v647_v58, %v421_v59 }
 0x1da   :  { %426 = vmax.xlane.f32.xlu0 %v422_v60 }
 0x1df   :  { %v423_v61 = vpop.f32.mrf.mxu3 }
 0x1e0   :  { %v424_v62 = vadd.f32 %v647_v58, %v423_v61 }
 0x1e2   :  { %428 = vmax.xlane.f32.xlu0 %v424_v62 }
 0x24d   :  { %v427_v63 = vpop.xlane.xlu0 %426 }
 0x24e   :  { %v430_v0 = vsub.f32 %v422_v60, %v427_v63 }
 0x250   :  { %v432_v1 = vmul.f32 1.442695, %v430_v0 }
 0x252   :  { %648 = vpow2.f32 %v432_v1 }
 0x255   :  { %v429_v2 = vpop.xlane.xlu0 %428 }
 0x256   :  { %v431_v3 = vsub.f32 %v424_v62, %v429_v2 }
 0x258   :  { %v649_v4 = vpop.eup %648  ;;  %v434_v5 = vmul.f32 1.442695, %v431_v3 }
 0x259   :  { %436 = vadd.xlane.f32.xlu1 %v649_v4 }
 0x25a   :  { %650 = vpow2.f32 %v434_v5 }
 0x260   :  { %v651_v6 = vpop.eup %650 }
 0x261   :  { %438 = vadd.xlane.f32.xlu1 %v651_v6 }
 0x2cc   :  { %v437_v7 = vpop.xlane.xlu1 %436 }
 0x2cd   :  { %652 = vlog2.f32 %v437_v7 }
 0x2d3   :  { %v653_v9 = vpop.eup %652 }
 0x2d4   :  { %v439_v8 = vpop.xlane.xlu1 %438  ;;  %v441_v10 = vmul.f32 0.6931472, %v653_v9 }
 0x2d5   :  { %654 = vlog2.f32 %v439_v8 }
 0x2d6   :  { %v444_v13 = vsub.f32 %v430_v0, %v441_v10 }
 0x2db   :  { %v655_v11 = vpop.eup %654 }
 0x2dc   :  { %v443_v12 = vmul.f32 0.6931472, %v655_v11 }
 0x2de   :  { %v445_v14 = vsub.f32 %v431_v3, %v443_v12 }
 0x2e0   :  { %v634_v15 = vpack.c.bf16 %v445_v14, %v444_v13 }
 0x2e2   :  { %635 = vst [vmem:[#allocation10] sm:$0xff] %v634_v15  }
 0x2e3   :  { %462 = dma.vmem_to_hbm [thread:$0]  %s455_s6, 128, %s457_s28, [#allocation4], %s785_s9, %s785_s9, %s786_s10  }
 0x2e4   :  { %782 = dma.done.wait [#allocation4], 128  }
 0x2e5   :  { %783 = vsyncadd [#allocation4], 4294967168 }
 0x2e6   :  { %467 = vsyncpa [#allocation3], 1 }
 0x2e7   :  { %468 = vsyncpa [#allocation6], 1 }
 0x2e8   :  { %469 = vsyncpa [#allocation9], 1 }
 0x2e9   :  { %470 = vsyncpa [#allocation4], 1 }

</bundles_post_ra>
